<compile_context>
chip_gen: v5e
topology: v5e:2x2
jax: 0.10.0
libtpu: 0.0.40
codegen_flags: <defaults>
</compile_context>

<pallas_src>
import jax
import jax.numpy as jnp
from jax.experimental import pallas as pl
from jax.experimental.pallas import tpu as pltpu


# ---------------------------------------------------------------------------
# Shared GRU-cell math (PyTorch GRUCell semantics, gate order r, z, n).
# Weights w_i / w_h are bf16 (H, 3H); x / h and all elementwise math are f32.
# ---------------------------------------------------------------------------
def _gru_gates(x, h, w_i, w_h, b_rz, b_in, b_hn):
    H = h.shape[-1]
    gi = jnp.dot(x.astype(jnp.bfloat16), w_i,
                 preferred_element_type=jnp.float32)           # (B, 3H)
    gh = jnp.dot(h.astype(jnp.bfloat16), w_h,
                 preferred_element_type=jnp.float32)           # (B, 3H)
    # r, z share the pre-combined bias b_rz = [b_ir+b_hr, b_iz+b_hz].
    rz = jax.nn.sigmoid(gi[:, :2 * H] + gh[:, :2 * H] + b_rz)  # (B, 2H)
    r = rz[:, :H]
    z = rz[:, H:]
    # n = tanh(W_in x + b_in + r * (W_hn h + b_hn))
    n = jnp.tanh(gi[:, 2 * H:] + b_in + r * (gh[:, 2 * H:] + b_hn))
    # h' = (1 - z) * n + z * h  ==  n + z * (h - n)
    return n + z * (h - n)


# ---------------------------------------------------------------------------
# Single-step kernel: one forward() call (matches the PyTorch module exactly).
# ---------------------------------------------------------------------------
def _rnn_step_kernel(obs_ref, h_ref,
                     w1_ref, b1_ref,
                     wi_ref, wh_ref, brz_ref, bin_ref, bhn_ref,
                     w2_ref, b2_ref,
                     q_ref, hout_ref):
    h = h_ref[...]                                             # read before any write
    x = jnp.dot(obs_ref[...].astype(jnp.bfloat16), w1_ref[...],
                preferred_element_type=jnp.float32) + b1_ref[...]
    x = jnp.maximum(x, 0.0)                                    # ReLU
    h_new = _gru_gates(x, h, wi_ref[...], wh_ref[...],
                       brz_ref[...], bin_ref[...], bhn_ref[...])
    q = jnp.dot(h_new.astype(jnp.bfloat16), w2_ref[...],
                preferred_element_type=jnp.float32) + b2_ref[...]
    q_ref[...] = q.astype(q_ref.dtype)
    hout_ref[...] = h_new.astype(hout_ref.dtype)


# ---------------------------------------------------------------------------
# T-step rollout kernel: gridless, everything resident in VMEM, time loop
# statically unrolled, h carried in vregs, q staged into a lane-dense
# (B, T*A) output slab with static lane offsets.
# ---------------------------------------------------------------------------
def _rnn_rollout_kernel(obs_ref, h0_ref,
                        w1_ref, b1_ref,
                        wi_ref, wh_ref, brz_ref, bin_ref, bhn_ref,
                        w2_ref, b2_ref,
                        q_ref, hout_ref):
    T = obs_ref.shape[0]
    A = b2_ref.shape[-1]

    # Hoist all weight/bias loads out of the time loop.
    w1 = w1_ref[...]
    b1 = b1_ref[...]
    w_i = wi_ref[...]
    w_h = wh_ref[...]
    b_rz = brz_ref[...]
    b_in = bin_ref[...]
    b_hn = bhn_ref[...]
    w2 = w2_ref[...]
    b2 = b2_ref[...]

    h = h0_ref[...]                                            # f32, lives in vregs
    for t in range(T):                                         # static unroll (T small)
        x = jnp.dot(obs_ref[t].astype(jnp.bfloat16), w1,
                    preferred_element_type=jnp.float32) + b1
        x = jnp.maximum(x, 0.0)
        h = _gru_gates(x, h, w_i, w_h, b_rz, b_in, b_hn)
        q = jnp.dot(h.astype(jnp.bfloat16), w2,
                    preferred_element_type=jnp.float32) + b2
        q_ref[:, t * A:(t + 1) * A] = q.astype(q_ref.dtype)    # static lane slice
    hout_ref[...] = h.astype(hout_ref.dtype)


# ---------------------------------------------------------------------------
# One-time parameter preprocessing (outside the hot path).
#  * transpose weights to (in, out), cast MXU operands to bf16
#  * concat GRU gate weights (r|z|n) so the kernel does 2 matmuls, not 6
#  * pre-combine the r/z bias pairs
# ---------------------------------------------------------------------------
def prepare_params(params):
    H = params["fc1_b"].shape[0]
    w_ih = params["gru_w_ih"]                  # (3H, H)  rows = [r | z | n]
    w_hh = params["gru_w_hh"]                  # (3H, H)
    b_ih = params["gru_b_ih"]                  # (3H,)
    b_hh = params["gru_b_hh"]                  # (3H,)
    f32 = jnp.float32
    bf16 = jnp.bfloat16
    return {
        "w1": params["fc1_w"].T.astype(bf16),                 # (D, H)
        "b1": params["fc1_b"][None, :].astype(f32),           # (1, H)
        "w_i": w_ih.T.astype(bf16),                           # (H, 3H)
        "w_h": w_hh.T.astype(bf16),                           # (H, 3H)
        "b_rz": (b_ih[:2 * H] + b_hh[:2 * H])[None, :].astype(f32),  # (1, 2H)
        "b_in": b_ih[2 * H:][None, :].astype(f32),            # (1, H)
        "b_hn": b_hh[2 * H:][None, :].astype(f32),            # (1, H)
        "w2": params["fc2_w"].T.astype(bf16),                 # (H, A)
        "b2": params["fc2_b"][None, :].astype(f32),           # (1, A)
    }


# ---------------------------------------------------------------------------
# Wrappers.
# ---------------------------------------------------------------------------
@jax.jit
def rnn_forward(obs, hidden_state, prep):
    """Single step: obs (B, D), hidden_state (B, H) -> (q (B, A), h (B, H))."""
    B = obs.shape[0]
    H = prep["b1"].shape[-1]
    A = prep["b2"].shape[-1]
    h_in = hidden_state.reshape(-1, H).astype(jnp.float32)

    inputs = (obs, h_in,
              prep["w1"], prep["b1"],
              prep["w_i"], prep["w_h"], prep["b_rz"], prep["b_in"], prep["b_hn"],
              prep["w2"], prep["b2"])
    vmem = pl.BlockSpec(memory_space=pltpu.MemorySpace.VMEM)

    q, h = pl.pallas_call(
        _rnn_step_kernel,
        out_shape=(jax.ShapeDtypeStruct((B, A), jnp.float32),
                   jax.ShapeDtypeStruct((B, H), jnp.float32)),
        in_specs=[vmem] * len(inputs),
        out_specs=(vmem, vmem),
        input_output_aliases={1: 1},           # h_in buffer reused for h out
    )(*inputs)
    return q, h


@jax.jit
def rnn_rollout(obs_seq, hidden_state, prep):
    """T steps with the recurrence inside one gridless kernel.

    obs_seq (T, B, D), hidden_state (B, H) -> (q_seq (T, B, A), h_T (B, H)).
    """
    T, B, D = obs_seq.shape
    H = prep["b1"].shape[-1]
    A = prep["b2"].shape[-1]
    h0 = hidden_state.reshape(-1, H).astype(jnp.float32)

    inputs = (obs_seq, h0,
              prep["w1"], prep["b1"],
              prep["w_i"], prep["w_h"], prep["b_rz"], prep["b_in"], prep["b_hn"],
              prep["w2"], prep["b2"])
    vmem = pl.BlockSpec(memory_space=pltpu.MemorySpace.VMEM)

    q_flat, h_T = pl.pallas_call(
        _rnn_rollout_kernel,
        out_shape=(jax.ShapeDtypeStruct((B, T * A), jnp.float32),  # lane-dense slab
                   jax.ShapeDtypeStruct((B, H), jnp.float32)),
        in_specs=[vmem] * len(inputs),
        out_specs=(vmem, vmem),
        input_output_aliases={1: 1},           # h0 buffer reused for h_T
    )(*inputs)
    # Layout plumbing back to (T, B, A) happens outside the kernel.
    q_seq = q_flat.reshape(B, T, A).transpose(1, 0, 2)
    return q_seq, h_T


# ---------------------------------------------------------------------------
# Pure-JAX f32 reference (torch GRUCell semantics) and param init.
# ---------------------------------------------------------------------------
def _reference_forward(obs, hidden_state, params):
    H = params["fc1_b"].shape[0]
    x = jax.nn.relu(obs @ params["fc1_w"].T + params["fc1_b"])
    h = hidden_state.reshape(-1, H)
    gi = x @ params["gru_w_ih"].T + params["gru_b_ih"]
    gh = h @ params["gru_w_hh"].T + params["gru_b_hh"]
    ir, iz, in_ = gi[:, :H], gi[:, H:2 * H], gi[:, 2 * H:]
    hr, hz, hn = gh[:, :H], gh[:, H:2 * H], gh[:, 2 * H:]
    r = jax.nn.sigmoid(ir + hr)
    z = jax.nn.sigmoid(iz + hz)
    n = jnp.tanh(in_ + r * hn)
    h_new = (1.0 - z) * n + z * h
    q = h_new @ params["fc2_w"].T + params["fc2_b"]
    return q, h_new


def init_params(key, input_dim, hidden_dim, n_actions):
    ks = jax.random.split(key, 8)
    u = lambda k, shape, bound: jax.random.uniform(k, shape, jnp.float32, -bound, bound)
    b1 = 1.0 / jnp.sqrt(input_dim)
    bh = 1.0 / jnp.sqrt(hidden_dim)
    return {
        "fc1_w": u(ks[0], (hidden_dim, input_dim), b1),
        "fc1_b": u(ks[1], (hidden_dim,), b1),
        "gru_w_ih": u(ks[2], (3 * hidden_dim, hidden_dim), bh),
        "gru_b_ih": u(ks[3], (3 * hidden_dim,), bh),
        "gru_w_hh": u(ks[4], (3 * hidden_dim, hidden_dim), bh),
        "gru_b_hh": u(ks[5], (3 * hidden_dim,), bh),
        "fc2_w": u(ks[6], (n_actions, hidden_dim), bh),
        "fc2_b": u(ks[7], (n_actions,), bh),
    }


if __name__ == "__main__":
    B = 8              # batch (n_agents * episodes)
    INPUT_DIM = 48     # obs dim
    HIDDEN = 32        # args.rnn_hidden_dim
    N_ACTIONS = 16     # args.n_actions
    T = 8              # rollout length (T * N_ACTIONS = 128 -> lane-dense q slab)

    key = jax.random.PRNGKey(0)
    k_obs, k_h, k_p, k_seq = jax.random.split(key, 4)

    obs = jax.random.normal(k_obs, (B, INPUT_DIM), jnp.float32)
    hidden = jax.random.normal(k_h, (B, HIDDEN), jnp.float32)
    params = init_params(k_p, INPUT_DIM, HIDDEN, N_ACTIONS)

    # One-time preprocessing (hoisted out of the hot path; weights -> bf16).
    prep = prepare_params(params)

    # --- single-step kernel (matches module.forward) ---
    q, h = rnn_forward(obs, hidden, prep)
    jax.block_until_ready((q, h))
    q_ref, h_ref = _reference_forward(obs, hidden, params)
    assert q.shape == (B, N_ACTIONS) and h.shape == (B, HIDDEN)
    # Tolerances relaxed vs the pure-f32 version: MXU operands are bf16.
    assert jnp.allclose(q, q_ref, atol=5e-2, rtol=5e-2)
    assert jnp.allclose(h, h_ref, atol=5e-2, rtol=5e-2)

    # --- T-step rollout kernel (recurrence inside one gridless pallas_call) ---
    obs_seq = jax.random.normal(k_seq, (T, B, INPUT_DIM), jnp.float32)
    q_seq, h_T = rnn_rollout(obs_seq, hidden, prep)
    jax.block_until_ready((q_seq, h_T))

    h_r = hidden
    q_steps = []
    for t in range(T):
        q_t, h_r = _reference_forward(obs_seq[t], h_r, params)
        q_steps.append(q_t)
    q_seq_ref = jnp.stack(q_steps)
    assert q_seq.shape == (T, B, N_ACTIONS) and h_T.shape == (B, HIDDEN)
    assert jnp.allclose(q_seq, q_seq_ref, atol=5e-2, rtol=5e-2)
    assert jnp.allclose(h_T, h_r, atol=5e-2, rtol=5e-2)

    print("KERNEL_OK")
</pallas_src>

<mosaic_0001>
module attributes {stable_mosaic.version = 11 : i64} {
  func.func @_rnn_step_kernel(%arg0: memref<8x48xf32, #tpu.memory_space<vmem>>, %arg1: memref<8x32xf32, #tpu.memory_space<vmem>>, %arg2: memref<48x32xbf16, #tpu.memory_space<vmem>>, %arg3: memref<1x32xf32, #tpu.memory_space<vmem>>, %arg4: memref<32x96xbf16, #tpu.memory_space<vmem>>, %arg5: memref<32x96xbf16, #tpu.memory_space<vmem>>, %arg6: memref<1x64xf32, #tpu.memory_space<vmem>>, %arg7: memref<1x32xf32, #tpu.memory_space<vmem>>, %arg8: memref<1x32xf32, #tpu.memory_space<vmem>>, %arg9: memref<32x16xbf16, #tpu.memory_space<vmem>>, %arg10: memref<1x16xf32, #tpu.memory_space<vmem>>, %arg11: memref<8x16xf32, #tpu.memory_space<vmem>>, %arg12: memref<8x32xf32, #tpu.memory_space<vmem>>) attributes {dimension_semantics = [], scalar_prefetch = 0 : i64, scratch_operands = 0 : i64, tpu.core_type = #tpu.core_type<tc>} {
    %c0 = arith.constant 0 : index
    %c0_0 = arith.constant 0 : index
    %0 = vector.load %arg1[%c0, %c0_0] : memref<8x32xf32, #tpu.memory_space<vmem>>, vector<8x32xf32>
    %c0_1 = arith.constant 0 : index
    %c0_2 = arith.constant 0 : index
    %1 = vector.load %arg0[%c0_1, %c0_2] : memref<8x48xf32, #tpu.memory_space<vmem>>, vector<8x48xf32>
    %2 = arith.truncf %1 : vector<8x48xf32> to vector<8x48xbf16>
    %c0_3 = arith.constant 0 : index
    %c0_4 = arith.constant 0 : index
    %3 = vector.load %arg2[%c0_3, %c0_4] : memref<48x32xbf16, #tpu.memory_space<vmem>>, vector<48x32xbf16>
    %cst = arith.constant dense<0.000000e+00> : vector<8x32xf32>
    %4 = tpu.matmul %2, %3, %cst {dimension_numbers = #tpu.dot_dimension_numbers<[1], [0], [0], [1], [0, 0, 1, 1], [], []>} : vector<8x48xbf16>, vector<48x32xbf16>, vector<8x32xf32> -> vector<8x32xf32>
    %c0_5 = arith.constant 0 : index
    %c0_6 = arith.constant 0 : index
    %5 = vector.load %arg3[%c0_5, %c0_6] : memref<1x32xf32, #tpu.memory_space<vmem>>, vector<1x32xf32>
    %6 = vector.broadcast %5 : vector<1x32xf32> to vector<8x32xf32>
    %7 = arith.addf %4, %6 : vector<8x32xf32>
    %cst_7 = arith.constant 0.000000e+00 : f32
    %8 = vector.broadcast %cst_7 : f32 to vector<8x32xf32>
    %9 = arith.maximumf %7, %8 : vector<8x32xf32>
    %c0_8 = arith.constant 0 : index
    %c0_9 = arith.constant 0 : index
    %10 = vector.load %arg4[%c0_8, %c0_9] : memref<32x96xbf16, #tpu.memory_space<vmem>>, vector<32x96xbf16>
    %c0_10 = arith.constant 0 : index
    %c0_11 = arith.constant 0 : index
    %11 = vector.load %arg5[%c0_10, %c0_11] : memref<32x96xbf16, #tpu.memory_space<vmem>>, vector<32x96xbf16>
    %c0_12 = arith.constant 0 : index
    %c0_13 = arith.constant 0 : index
    %12 = vector.load %arg6[%c0_12, %c0_13] : memref<1x64xf32, #tpu.memory_space<vmem>>, vector<1x64xf32>
    %c0_14 = arith.constant 0 : index
    %c0_15 = arith.constant 0 : index
    %13 = vector.load %arg7[%c0_14, %c0_15] : memref<1x32xf32, #tpu.memory_space<vmem>>, vector<1x32xf32>
    %c0_16 = arith.constant 0 : index
    %c0_17 = arith.constant 0 : index
    %14 = vector.load %arg8[%c0_16, %c0_17] : memref<1x32xf32, #tpu.memory_space<vmem>>, vector<1x32xf32>
    %15 = arith.truncf %9 : vector<8x32xf32> to vector<8x32xbf16>
    %cst_18 = arith.constant dense<0.000000e+00> : vector<8x96xf32>
    %16 = tpu.matmul %15, %10, %cst_18 {dimension_numbers = #tpu.dot_dimension_numbers<[1], [0], [0], [1], [0, 0, 1, 1], [], []>} : vector<8x32xbf16>, vector<32x96xbf16>, vector<8x96xf32> -> vector<8x96xf32>
    %17 = arith.truncf %0 : vector<8x32xf32> to vector<8x32xbf16>
    %cst_19 = arith.constant dense<0.000000e+00> : vector<8x96xf32>
    %18 = tpu.matmul %17, %11, %cst_19 {dimension_numbers = #tpu.dot_dimension_numbers<[1], [0], [0], [1], [0, 0, 1, 1], [], []>} : vector<8x32xbf16>, vector<32x96xbf16>, vector<8x96xf32> -> vector<8x96xf32>
    %19 = vector.extract_strided_slice %16 {offsets = [0, 0], sizes = [8, 64], strides = [1, 1]} : vector<8x96xf32> to vector<8x64xf32>
    %20 = vector.extract_strided_slice %18 {offsets = [0, 0], sizes = [8, 64], strides = [1, 1]} : vector<8x96xf32> to vector<8x64xf32>
    %21 = arith.addf %19, %20 : vector<8x64xf32>
    %22 = vector.broadcast %12 : vector<1x64xf32> to vector<8x64xf32>
    %23 = arith.addf %21, %22 : vector<8x64xf32>
    %24 = arith.negf %23 : vector<8x64xf32>
    %25 = math.exp %24 : vector<8x64xf32>
    %cst_20 = arith.constant 1.000000e+00 : f32
    %26 = vector.broadcast %cst_20 : f32 to vector<8x64xf32>
    %27 = arith.addf %26, %25 : vector<8x64xf32>
    %28 = arith.divf %26, %27 : vector<8x64xf32>
    %29 = vector.extract_strided_slice %28 {offsets = [0, 0], sizes = [8, 32], strides = [1, 1]} : vector<8x64xf32> to vector<8x32xf32>
    %30 = vector.extract_strided_slice %28 {offsets = [0, 32], sizes = [8, 32], strides = [1, 1]} : vector<8x64xf32> to vector<8x32xf32>
    %31 = vector.extract_strided_slice %16 {offsets = [0, 64], sizes = [8, 32], strides = [1, 1]} : vector<8x96xf32> to vector<8x32xf32>
    %32 = vector.broadcast %13 : vector<1x32xf32> to vector<8x32xf32>
    %33 = arith.addf %31, %32 : vector<8x32xf32>
    %34 = vector.extract_strided_slice %18 {offsets = [0, 64], sizes = [8, 32], strides = [1, 1]} : vector<8x96xf32> to vector<8x32xf32>
    %35 = vector.broadcast %14 : vector<1x32xf32> to vector<8x32xf32>
    %36 = arith.addf %34, %35 : vector<8x32xf32>
    %37 = arith.mulf %29, %36 : vector<8x32xf32>
    %38 = arith.addf %33, %37 : vector<8x32xf32>
    %39 = math.tanh %38 : vector<8x32xf32>
    %40 = arith.subf %0, %39 : vector<8x32xf32>
    %41 = arith.mulf %30, %40 : vector<8x32xf32>
    %42 = arith.addf %39, %41 : vector<8x32xf32>
    %43 = arith.truncf %42 : vector<8x32xf32> to vector<8x32xbf16>
    %c0_21 = arith.constant 0 : index
    %c0_22 = arith.constant 0 : index
    %44 = vector.load %arg9[%c0_21, %c0_22] : memref<32x16xbf16, #tpu.memory_space<vmem>>, vector<32x16xbf16>
    %cst_23 = arith.constant dense<0.000000e+00> : vector<8x16xf32>
    %45 = tpu.matmul %43, %44, %cst_23 {dimension_numbers = #tpu.dot_dimension_numbers<[1], [0], [0], [1], [0, 0, 1, 1], [], []>} : vector<8x32xbf16>, vector<32x16xbf16>, vector<8x16xf32> -> vector<8x16xf32>
    %c0_24 = arith.constant 0 : index
    %c0_25 = arith.constant 0 : index
    %46 = vector.load %arg10[%c0_24, %c0_25] : memref<1x16xf32, #tpu.memory_space<vmem>>, vector<1x16xf32>
    %47 = vector.broadcast %46 : vector<1x16xf32> to vector<8x16xf32>
    %48 = arith.addf %45, %47 : vector<8x16xf32>
    %c0_26 = arith.constant 0 : index
    %c0_27 = arith.constant 0 : index
    %49 = vector.load %arg11[%c0_26, %c0_27] : memref<8x16xf32, #tpu.memory_space<vmem>>, vector<8x16xf32>
    tpu.vector_store %arg11[%c0_26, %c0_27], %48 {strides = array<i32>} : memref<8x16xf32, #tpu.memory_space<vmem>>, vector<8x16xf32>,
    %c0_28 = arith.constant 0 : index
    %c0_29 = arith.constant 0 : index
    %50 = vector.load %arg12[%c0_28, %c0_29] : memref<8x32xf32, #tpu.memory_space<vmem>>, vector<8x32xf32>
    tpu.vector_store %arg12[%c0_28, %c0_29], %42 {strides = array<i32>} : memref<8x32xf32, #tpu.memory_space<vmem>>, vector<8x32xf32>,
    return
  }
}

</mosaic_0001>

<bundles_post_ra>
// kernel: rnn_forward.1
= control target key start
LH: loop header
LB: loop body
LE: loop exit
PB: predicated region body
PF: predicated region fallthrough
CT: control target
= control target key end

     0   :  { %18 = vsyncpa [#allocation3], 0  ;;  %s602_s0 = inlined_call_operand.vmem [shape: f32[8,48], index: 0, kind: input, shape index: {}]   ;;  %s603_s1 = inlined_call_operand.hbm [shape: f32[8,32], index: 1, kind: input, shape index: {}, may-alias: {1,12}]   ;;  %s604_s2 = inlined_call_operand.vmem [shape: bf16[48,32], index: 2, kind: input, shape index: {}]   ;;  %s605_s3 = inlined_call_operand.vmem [shape: f32[1,32], index: 3, kind: input, shape index: {}]   ;;  %s606_s4 = inlined_call_operand.vmem [shape: bf16[32,96], index: 4, kind: input, shape index: {}]   ;;  %s607_s5 = inlined_call_operand.vmem [shape: bf16[32,96], index: 5, kind: input, shape index: {}]   ;;  %s608_s6 = inlined_call_operand.vmem [shape: f32[1,64], index: 6, kind: input, shape index: {}]   ;;  %s609_s7 = inlined_call_operand.vmem [shape: f32[1,32], index: 7, kind: input, shape index: {}]   ;;  %s610_s8 = inlined_call_operand.vmem [shape: f32[1,32], index: 8, kind: input, shape index: {}]   ;;  %s611_s9 = inlined_call_operand.vmem [shape: bf16[32,16], index: 9, kind: input, shape index: {}]   ;;  %s612_s10 = inlined_call_operand.vmem [shape: f32[1,16], index: 10, kind: input, shape index: {}]   ;;  %s613_s11 = inlined_call_operand.hbm [shape: f32[8,16], index: 11, kind: output, shape index: {0}]   ;;  %s614_s12 = inlined_call_operand.hbm [shape: f32[8,32], index: 12, kind: output, shape index: {1}, may-alias: {1,12}]  }
   0x1   :  { %19 = vsyncpa [#allocation4], 0 }
   0x2   :  { %20 = vsyncpa [#allocation7], 0  ;;  %s28_s23 = sshll.u32 %s603_s1, 4  ;;  %s462_s24 = smov [#allocation2]   ;;  %s29_s23 = int_to_ptr.hbm [resolvable:$true] %s28_s23 }
   0x3   :  { %s30_s25 = sshll.u32 %s462_s24, 4  ;;  %s31_s25 = int_to_ptr.vmem [resolvable:$true] %s30_s25 }
   0x4   :  { %33 = dma.hbm_to_vmem [thread:$0]  %s29_s23, 128, %s31_s25, [#allocation3]  }
   0x5   :  { %456 = dma.done.wait [#allocation3], 128  }
   0x6   :  { %457 = vsyncadd [#allocation3], 4294967168  ;;  %v361_v0 = vld [vmem:[%s604_s2 + $0x10] sm:$0xff]  ;;  %v360_v1 = vld [vmem:[%s604_s2 + $0x8] sm:$0xff]  ;;  %s463_s17 = smov 64   ;;  %vm130_vm0 = vcmask 261120  }
   0x7   :  { %v365_v2 = vld [vmem:[%s607_s5 + $0x8] sm:$0xff]  ;;  %97 = vmatpush.bf16.msra.mxu0 %v361_v0  ;;  %v364_v3 = vld [vmem:[%s607_s5] sm:$0xff]  ;;  %vm88_vm1 = vcmask 392192   ;;  %s465_s29 = smov [#allocation6]   ;;  %s303_s14 = sshll.u32 %s614_s12, 4  ;;  %vm278_vm6 = vcmask 130048   ;;  %s304_s14 = int_to_ptr.hbm [resolvable:$true] %s303_s14 }
   0x8   :  { %v373_v4 = vld [vmem:[%s610_s8] ss:$0 sm:$0xff]  ;;  %169 = vmatpush.bf16.msra.mxu2 %v365_v2  ;;  %v363_v10 = vld [vmem:[%s606_s4 + $0x8] sm:$0xff]  ;;  %s301_s30 = sshll.u32 %s465_s29, 4  ;;  %s292_s20 = sshll.u32 %s613_s11, 4  ;;  %s302_s30 = int_to_ptr.vmem [resolvable:$true] %s301_s30  ;;  %s293_s20 = int_to_ptr.hbm [resolvable:$true] %s292_s20 }
   0x9   :  { %v550_v5 = vld [vmem:[#allocation2] sm:$0xff]  ;;  %208 = vrot.lane.b32.xlu0 %v373_v4, %s463_s17  ;;  %140 = vmatpush.bf16.msra.mxu1 %v363_v10  ;;  %v367_v55 = vld [vmem:[%s611_s9 + $0x8] sm:$0xff] }
   0xa   :  { %v359_v6 = vld [vmem:[%s604_s2] sm:$0xff]  ;;  %v147_v8 = vpack.c.bf16 %v550_v5, %v550_v5  ;;  %271 = vmatpush.bf16.msra.mxu3 %v367_v55 }
   0xb   :  { %98 = vmatpush.bf16.msra.mxu0 %v360_v1  ;;  %v58_v7 = vld [vmem:[%s602_s0] sm:$0xff] }
   0xc   :  { %170 = vmatpush.bf16.msra.mxu2 %v364_v3  ;;  %v59_v9 = vpack.c.bf16 %v58_v7, %v58_v7  ;;  %v362_v11 = vld [vmem:[%s606_s4] sm:$0xff] }
   0xd   :  { %141 = vmatpush.bf16.msra.mxu1 %v362_v11  ;;  %v375_v12 = vld [vmem:[%s609_s7] ss:$0 sm:$0xff] }
   0xe   :  { %202 = vrot.lane.b32.xlu1 %v375_v12, %s463_s17  ;;  %v374_v13 = vld [vmem:[%s605_s3] ss:$0 sm:$0xff]  ;;  %s464_s3 = smov 32  }
   0xf   :  { %99 = vmatpush.bf16.msra.mxu0 %v359_v6  ;;  %348 = vmatmul.msk.bf16.vlgmr.msra.gmra.mxu2 %vm130_vm0, %v147_v8  ;;  %v376_v23 = vld [vmem:[%s608_s6] ss:$0 sm:$0xff] }
  0x10   :  { %v366_v56 = vld [vmem:[%s611_s9] sm:$0xff]  ;;  %s466_s9 = smov [#allocation5]  }
  0x11   :  { %272 = vmatpush.bf16.msra.mxu3 %v366_v56  ;;  %v377_v59 = vld [vmem:[%s612_s10] ss:$0 sm:$0xff] }
  0x12   :  { %330 = vmatmul.msk.bf16.vlgmr.msra.gmra.mxu0 %vm88_vm1, %v59_v9 }
  0x7b   :  { %v209_v16 = vpop.permute.xlu0 %208 }
  0x80   :  { %v203_v43 = vpop.permute.xlu1 %202 }
  0x8f   :  { %v101_v14 = vpop.f32.mrf.mxu0 }
  0x90   :  { %v102_v15 = vadd.f32 %v374_v13, %v101_v14 }
  0x92   :  { %v105_v17 = vmax.f32 %v102_v15, 0.0  ;;  %v172_v18 = vpop.f32.mrf.mxu2 }
  0x93   :  { %v211_v19 = vadd.f32 %v209_v16, %v172_v18 }
  0x94   :  { %v117_v20 = vpack.c.bf16 %v105_v17, %v105_v17 }
  0x95   :  { %213 = vrot.lane.b32.xlu0 %v211_v19, %s463_s17 }
  0x96   :  { %339 = vmatmul.msk.bf16.vlgmr.msra.gmra.mxu1 %vm130_vm0, %v117_v20 }
  0x97   :  { %v103_v21 = vpop.f32.mrf.mxu0 }
  0x9a   :  { %v174_v22 = vpop.f32.mrf.mxu2 }
 0x107   :  { %v214_v38 = vpop.permute.xlu0 %213 }
 0x113   :  { %v143_v24 = vpop.f32.mrf.mxu1 }
 0x114   :  { %v176_v25 = vadd.f32 %v172_v18, %v143_v24  ;;  %v205_v44 = vadd.f32 %v203_v43, %v143_v24 }
 0x116   :  { %v180_v26 = vadd.f32 %v376_v23, %v176_v25 }
 0x118   :  { %v349_v27 = vmul.f32 -1.442695, %v180_v26 }
 0x11a   :  { %378 = vpow2.f32 %v349_v27 }
 0x11b   :  { %v145_v28 = vpop.f32.mrf.mxu1 }
 0x120   :  { %v379_v29 = vpop.eup %378 }
 0x121   :  { %v184_v30 = vadd.f32 1.0, %v379_v29 }
 0x123   :  { %380 = vrcp.f32 %v184_v30  ;;  %v196_v34 = vand.u32 2147483648, %v184_v30  ;;  %v194_v36 = vand.u32 2147483647, %v184_v30  ;;  %vm190_vm3 = vweird.f32 %v184_v30 }
 0x125   :  { %v197_v39 = vor.u32 1.1754944e-38, %v196_v34  ;;  %vm195_vm5 = vcmp.eq.f32.partialorder %v194_v36, 8.507059e+37 }
 0x129   :  { %v381_v31 = vpop.eup %380 }
 0x12a   :  { %v186_v32 = vmul.f32 %v381_v31, %v184_v30  ;;  %vm191_vm2 = vweird.f32 %v381_v31 }
 0x12b   :  { %vm192_vm4 = vmor %vm190_vm3, %vm191_vm2 }
 0x12c   :  { %v187_v33 = vsub.f32 1.0, %v186_v32 }
 0x12e   :  { %v188_v35 = vmul.f32 %v381_v31, %v187_v33 }
 0x130   :  { %v189_v37 = vadd.f32 %v381_v31, %v188_v35 }
 0x132   :  { %v193_v40 = vsel %vm192_vm4, %v381_v31, %v189_v37 }
 0x133   :  { %v198_v41 = vsel %vm195_vm5, %v197_v39, %v193_v40 }
 0x134   :  { %v216_v42 = vmul.f32 %v214_v38, %v198_v41 }
 0x136   :  { %218 = vrot.lane.b32.xlu1 %v216_v42, %s463_s17 }
 0x1a8   :  { %v219_v45 = vpop.permute.xlu1 %218 }
 0x1a9   :  { %v221_v46 = vadd.f32 %v219_v45, %v205_v44 }
 0x1ab   :  { %382 = vtanh.f32 %v221_v46 }
 0x1b1   :  { %v383_v47 = vpop.eup %382 }
 0x1b2   :  { %224 = vrot.lane.b32.xlu2 %v383_v47, %s463_s17 }
 0x20c   :  { %v225_v48 = vpop.permute.xlu2 %224 }
 0x20d   :  { %v227_v49 = vsub.f32 %v550_v5, %v225_v48 }
 0x20f   :  { %229 = vrot.lane.b32.xlu2 %v227_v49, %s464_s3 }
 0x269   :  { %v230_v50 = vpop.permute.xlu2 %229 }
 0x26a   :  { %v232_v51 = vmul.f32 %v230_v50, %v198_v41 }
 0x26c   :  { %234 = vrot.lane.b32.xlu0 %v232_v51, %s464_s3 }
 0x2de   :  { %v235_v52 = vpop.permute.xlu0 %234 }
 0x2df   :  { %v237_v53 = vadd.f32 %v383_v47, %v235_v52 }
 0x2e1   :  { %v238_v54 = vpack.c.bf16 %v237_v53, %v237_v53  ;;  %281 = vrot.lane.b32.xlu2 %v237_v53, %s463_s17 }
 0x2e3   :  { %248 = vrot.lane.b32.xlu1 %v238_v54, %s463_s17  ;;  %s290_s17 = sshll.u32 %s466_s9, 4  ;;  %s291_s17 = int_to_ptr.vmem [resolvable:$true] %s290_s17 }
 0x33b   :  { %v282_v57 = vpop.permute.xlu2 %281 }
 0x33c   :  { %284 = vst.msk [vmem:[#allocation6] sm:$0xff] %vm130_vm0, %v282_v57 }
 0x33d   :  { %306 = dma.vmem_to_hbm [thread:$0]  %s302_s30, 128, %s304_s14, [#allocation7]  }
 0x355   :  { %v249_v58 = vpop.permute.xlu1 %248 }
 0x356   :  { %358 = vmatmul.msk.bf16.vlgmr.msra.gmra.mxu3 %vm130_vm0, %v249_v58 }
 0x3d9   :  { %v274_v60 = vpop.f32.mrf.mxu3 }
 0x3da   :  { %v275_v61 = vadd.f32 %v377_v59, %v274_v60 }
 0x3dc   :  { %279 = vst.msk [vmem:[#allocation5] sm:$0xff] %vm278_vm6, %v275_v61 }
 0x3dd   :  { %295 = dma.vmem_to_hbm [thread:$0]  %s291_s17, 128, %s293_s20, [#allocation4]  }
 0x3e1   :  { %v276_v62 = vpop.f32.mrf.mxu3 }
 0x3e2   :  { %458 = dma.done.wait [#allocation4], 128  }
 0x3e3   :  { %459 = vsyncadd [#allocation4], 4294967168 }
 0x3e4   :  { %460 = dma.done.wait [#allocation7], 128  }
 0x3e5   :  { %461 = vsyncadd [#allocation7], 4294967168 }
 0x3e6   :  { %315 = vsyncpa [#allocation3], 1 }
 0x3e7   :  { %316 = vsyncpa [#allocation4], 1 }
 0x3e8   :  { %317 = vsyncpa [#allocation7], 1 }

</bundles_post_ra>
